<compile_context>
chip_gen: v5e
topology: v5e:2x2
jax: 0.10.0
libtpu: 0.0.40
codegen_flags: <defaults>
</compile_context>

<pallas_src>
import math
from functools import partial

import jax
import jax.numpy as jnp
from jax.experimental import pallas as pl
from jax.experimental.pallas import tpu as pltpu

HIDDEN_DIM = 32                 # config.hidden_dim
DECODER_NUM = 32
IN_DIM = HIDDEN_DIM * 5         # 160
MID_DIM = HIDDEN_DIM * 2        # 64

LANE = 128


def _round_up(x, m):
    return ((x + m - 1) // m) * m


def emomlp_kernel(x_ref, w1_ref, b1_ref, w2_ref, b2_ref, o_ref):
    # Cast the streamed x tile to the MXU dtype (no-op when dtypes already match).
    x = x_ref[...].astype(w1_ref.dtype)
    # First linear: (TB, IN) @ (IN, MID_P), f32 accumulation on the MXU.
    h = jnp.dot(x, w1_ref[...], preferred_element_type=jnp.float32)
    # Bias add + ReLU kept in f32 (biases are stored f32).
    h = jnp.maximum(h + b1_ref[...], 0.0)
    # Second linear: cast to the weight dtype only at the MXU input; accumulate f32.
    out = jnp.dot(h.astype(w2_ref.dtype), w2_ref[...],
                  preferred_element_type=jnp.float32)
    o_ref[...] = (out + b2_ref[...]).astype(o_ref.dtype)


@partial(jax.jit, static_argnames=("block_rows", "compute_dtype"))
def emomlp_forward(x, w1, b1, w2, b2, *, block_rows=4096,
                   compute_dtype=jnp.bfloat16):
    """Fused EmoMLP forward.

    x:  (B, IN_DIM)          -- streamed in its own dtype (supply bf16 for full BW win)
    w1: (IN_DIM, MID_DIM)    b1: (1, MID_DIM) or (MID_DIM,)
    w2: (MID_DIM, OUT_DIM)   b2: (1, OUT_DIM) or (OUT_DIM,)
    Returns (B, OUT_DIM) in x.dtype.
    """
    B, in_dim = x.shape
    mid = w1.shape[1]
    out_dim = w2.shape[1]

    mxu_dtype = jnp.dtype(compute_dtype)
    x_dtype = jnp.dtype(x.dtype)
    store_dtype = mxu_dtype     # output tile is stored in the compute dtype

    # ---- lane-pad the narrow dims (64 -> 128, 32 -> 128) with exact zeros ----
    mid_p = _round_up(mid, LANE)
    out_p = _round_up(out_dim, LANE)

    w1p = jnp.zeros((in_dim, mid_p), mxu_dtype).at[:, :mid].set(w1.astype(mxu_dtype))
    b1p = jnp.zeros((1, mid_p), jnp.float32).at[:, :mid].set(
        b1.reshape(1, -1).astype(jnp.float32))
    w2p = jnp.zeros((mid_p, out_p), mxu_dtype).at[:mid, :out_dim].set(w2.astype(mxu_dtype))
    b2p = jnp.zeros((1, out_p), jnp.float32).at[:, :out_dim].set(
        b2.reshape(1, -1).astype(jnp.float32))

    # ---- batch tiling -------------------------------------------------------
    # Sublane multiple: 16 if either the streamed x or the stored output is
    # sub-32-bit (packed sublane layout), else 8.
    row_mult = 8 if (x_dtype.itemsize >= 4 and store_dtype.itemsize >= 4) else 16

    # Split B as evenly as possible into tiles of <= block_rows rows so padding
    # stays below row_mult rows per tile (and is zero when it divides evenly).
    n_tiles = max(1, -(-B // block_rows))
    # Keep >= 2 grid steps for large batches so the "parallel" batch axis can
    # shard across both TensorCores on v7x.
    if n_tiles == 1 and B >= 2048:
        n_tiles = 2
    tb = _round_up(-(-B // n_tiles), row_mult)
    b_pad = tb * n_tiles

    # Only materialize a padded copy of x when the tile doesn't divide B.
    xp = x if b_pad == B else jnp.pad(x, ((0, b_pad - B), (0, 0)))

    grid = (n_tiles,)

    # ---- VMEM budget: actual need + headroom (never request all of v7x's 64 MiB) --
    vmem_needed = (
        2 * tb * in_dim * x_dtype.itemsize                          # x double-buffer
        + 2 * tb * out_p * store_dtype.itemsize                     # out double-buffer
        + 2 * (in_dim * mid_p + mid_p * out_p) * mxu_dtype.itemsize # weights (resident)
        + 2 * (mid_p + out_p) * 4                                   # biases (f32)
        + tb * (mid_p + out_p) * 4                                  # f32 intermediates
    )
    vmem_limit = int(min(max(vmem_needed + (8 << 20), 16 << 20), 48 << 20))

    cost = pl.CostEstimate(
        flops=2 * B * (in_dim * mid + mid * out_dim),               # logical work
        transcendentals=0,
        bytes_accessed=(b_pad * in_dim * x_dtype.itemsize           # real streamed bytes
                        + (in_dim * mid_p + mid_p * out_p) * mxu_dtype.itemsize
                        + (mid_p + out_p) * 4
                        + b_pad * out_p * store_dtype.itemsize),
    )

    out = pl.pallas_call(
        emomlp_kernel,
        out_shape=jax.ShapeDtypeStruct((b_pad, out_p), store_dtype),
        grid_spec=pl.GridSpec(
            grid=grid,
            in_specs=[
                pl.BlockSpec((tb, in_dim), lambda i: (i, 0)),      # x streams per tile
                pl.BlockSpec((in_dim, mid_p), lambda i: (0, 0)),   # weights VMEM-resident
                pl.BlockSpec((1, mid_p), lambda i: (0, 0)),
                pl.BlockSpec((mid_p, out_p), lambda i: (0, 0)),
                pl.BlockSpec((1, out_p), lambda i: (0, 0)),
            ],
            out_specs=pl.BlockSpec((tb, out_p), lambda i: (i, 0)),
        ),
        compiler_params=pltpu.CompilerParams(
            dimension_semantics=("parallel",),
            vmem_limit_bytes=vmem_limit,
        ),
        cost_estimate=cost,
    )(xp, w1p, b1p, w2p, b2p)

    # Slice off batch + lane padding (padded rows hold garbage = relu(b1)@w2+b2);
    # return in the caller's dtype.
    return out[:B, :out_dim].astype(x.dtype)


def init_params(key):
    """Deterministic init mimicking nn.Linear's default uniform(-1/sqrt(fan_in), ...)."""
    k1, k2, k3, k4 = jax.random.split(key, 4)
    bound1 = 1.0 / math.sqrt(IN_DIM)
    bound2 = 1.0 / math.sqrt(MID_DIM)
    w1 = jax.random.uniform(k1, (IN_DIM, MID_DIM), jnp.float32, -bound1, bound1)
    b1 = jax.random.uniform(k2, (1, MID_DIM), jnp.float32, -bound1, bound1)
    w2 = jax.random.uniform(k3, (MID_DIM, DECODER_NUM), jnp.float32, -bound2, bound2)
    b2 = jax.random.uniform(k4, (1, DECODER_NUM), jnp.float32, -bound2, bound2)
    return w1, b1, w2, b2


if __name__ == "__main__":
    key = jax.random.PRNGKey(0)
    kx, kp = jax.random.split(key)
    w1, b1, w2, b2 = init_params(kp)

    # Small batch smoke test.
    B = 8
    x = jax.random.normal(kx, (B, IN_DIM), jnp.float32)
    ref = jnp.maximum(x @ w1 + b1, 0.0) @ w2 + b2

    # Exact f32 path (same math as the PyTorch forward).
    out_f32 = jax.block_until_ready(
        emomlp_forward(x, w1, b1, w2, b2, compute_dtype=jnp.float32))
    assert out_f32.shape == (B, DECODER_NUM) and out_f32.dtype == x.dtype
    assert jnp.allclose(out_f32, ref, atol=1e-5, rtol=1e-5)

    # Default bf16 streaming path (bf16 weights + bf16 output store) — looser tol.
    out_bf = jax.block_until_ready(emomlp_forward(x, w1, b1, w2, b2))
    assert out_bf.shape == (B, DECODER_NUM) and out_bf.dtype == x.dtype
    assert jnp.allclose(out_bf, ref, atol=5e-2, rtol=5e-2)

    # Producer-supplied bf16 x: full read-bandwidth path, no wrapper dtype copy.
    out_bfx = jax.block_until_ready(
        emomlp_forward(x.astype(jnp.bfloat16), w1, b1, w2, b2))
    assert out_bfx.dtype == jnp.bfloat16
    assert jnp.allclose(out_bfx.astype(jnp.float32), ref, atol=5e-2, rtol=5e-2)

    # Multi-tile grid (pipeline path across 3 grid steps), f32 exact.
    B2 = 300
    x2 = jax.random.normal(kx, (B2, IN_DIM), jnp.float32)
    ref2 = jnp.maximum(x2 @ w1 + b1, 0.0) @ w2 + b2
    out2 = jax.block_until_ready(
        emomlp_forward(x2, w1, b1, w2, b2, block_rows=128,
                       compute_dtype=jnp.float32))
    assert out2.shape == (B2, DECODER_NUM)
    assert jnp.allclose(out2, ref2, atol=1e-5, rtol=1e-5)

    # Multi-tile default bf16 path.
    out3 = jax.block_until_ready(
        emomlp_forward(x2, w1, b1, w2, b2, block_rows=128))
    assert jnp.allclose(out3, ref2, atol=5e-2, rtol=5e-2)

    print("KERNEL_OK")
</pallas_src>

<mosaic_0001>
module attributes {stable_mosaic.version = 11 : i64} {
  func.func @emomlp_kernel(%arg0: i32, %arg1: memref<8x160xf32, #tpu.memory_space<vmem>>, %arg2: memref<160x128xf32, #tpu.memory_space<vmem>>, %arg3: memref<1x128xf32, #tpu.memory_space<vmem>>, %arg4: memref<128x128xf32, #tpu.memory_space<vmem>>, %arg5: memref<1x128xf32, #tpu.memory_space<vmem>>, %arg6: memref<8x128xf32, #tpu.memory_space<vmem>>) attributes {dimension_semantics = [#tpu.dimension_semantics<parallel>], iteration_bounds = array<i64: 1>, scalar_prefetch = 0 : i64, scratch_operands = 0 : i64, tpu.core_type = #tpu.core_type<tc>, window_params = [{transform_indices = @transform_0, window_bounds = array<i64: 8, 160>}, {pipeline_mode = #tpu.pipeline_mode<synchronous>, transform_indices = @transform_1, window_bounds = array<i64: 160, 128>}, {pipeline_mode = #tpu.pipeline_mode<synchronous>, transform_indices = @transform_2, window_bounds = array<i64: 1, 128>}, {pipeline_mode = #tpu.pipeline_mode<synchronous>, transform_indices = @transform_3, window_bounds = array<i64: 128, 128>}, {pipeline_mode = #tpu.pipeline_mode<synchronous>, transform_indices = @transform_4, window_bounds = array<i64: 1, 128>}, {transform_indices = @transform_5, window_bounds = array<i64: 8, 128>}]} {
    %c0 = arith.constant 0 : index
    %c0_0 = arith.constant 0 : index
    %0 = vector.load %arg1[%c0, %c0_0] : memref<8x160xf32, #tpu.memory_space<vmem>>, vector<8x160xf32>
    %c0_1 = arith.constant 0 : index
    %c0_2 = arith.constant 0 : index
    %1 = vector.load %arg2[%c0_1, %c0_2] : memref<160x128xf32, #tpu.memory_space<vmem>>, vector<160x128xf32>
    %cst = arith.constant dense<0.000000e+00> : vector<8x128xf32>
    %2 = tpu.matmul %0, %1, %cst {dimension_numbers = #tpu.dot_dimension_numbers<[1], [0], [0], [1], [0, 0, 1, 1], [], []>} : vector<8x160xf32>, vector<160x128xf32>, vector<8x128xf32> -> vector<8x128xf32>
    %c0_3 = arith.constant 0 : index
    %c0_4 = arith.constant 0 : index
    %3 = vector.load %arg3[%c0_3, %c0_4] : memref<1x128xf32, #tpu.memory_space<vmem>>, vector<1x128xf32>
    %4 = vector.broadcast %3 : vector<1x128xf32> to vector<8x128xf32>
    %5 = arith.addf %2, %4 : vector<8x128xf32>
    %cst_5 = arith.constant 0.000000e+00 : f32
    %6 = vector.broadcast %cst_5 : f32 to vector<8x128xf32>
    %7 = arith.maximumf %5, %6 : vector<8x128xf32>
    %c0_6 = arith.constant 0 : index
    %c0_7 = arith.constant 0 : index
    %8 = vector.load %arg4[%c0_6, %c0_7] : memref<128x128xf32, #tpu.memory_space<vmem>>, vector<128x128xf32>
    %cst_8 = arith.constant dense<0.000000e+00> : vector<8x128xf32>
    %9 = tpu.matmul %7, %8, %cst_8 {dimension_numbers = #tpu.dot_dimension_numbers<[1], [0], [0], [1], [0, 0, 1, 1], [], []>} : vector<8x128xf32>, vector<128x128xf32>, vector<8x128xf32> -> vector<8x128xf32>
    %c0_9 = arith.constant 0 : index
    %c0_10 = arith.constant 0 : index
    %10 = vector.load %arg5[%c0_9, %c0_10] : memref<1x128xf32, #tpu.memory_space<vmem>>, vector<1x128xf32>
    %11 = vector.broadcast %10 : vector<1x128xf32> to vector<8x128xf32>
    %12 = arith.addf %9, %11 : vector<8x128xf32>
    %c0_11 = arith.constant 0 : index
    %c0_12 = arith.constant 0 : index
    %13 = vector.load %arg6[%c0_11, %c0_12] : memref<8x128xf32, #tpu.memory_space<vmem>>, vector<8x128xf32>
    tpu.vector_store %arg6[%c0_11, %c0_12], %12 {strides = array<i32>} : memref<8x128xf32, #tpu.memory_space<vmem>>, vector<8x128xf32>,
    return
  }
  func.func @transform_0(%arg0: i32) -> (i32, i32) {
    %c0_i32 = arith.constant 0 : i32
    %c0_i32_0 = arith.constant 0 : i32
    return %arg0, %c0_i32 : i32, i32
  }
  func.func @transform_1(%arg0: i32) -> (i32, i32) {
    %c0_i32 = arith.constant 0 : i32
    %c0_i32_0 = arith.constant 0 : i32
    %c0_i32_1 = arith.constant 0 : i32
    return %c0_i32, %c0_i32_0 : i32, i32
  }
  func.func @transform_2(%arg0: i32) -> (i32, i32) {
    %c0_i32 = arith.constant 0 : i32
    %c0_i32_0 = arith.constant 0 : i32
    %c0_i32_1 = arith.constant 0 : i32
    return %c0_i32, %c0_i32_0 : i32, i32
  }
  func.func @transform_3(%arg0: i32) -> (i32, i32) {
    %c0_i32 = arith.constant 0 : i32
    %c0_i32_0 = arith.constant 0 : i32
    %c0_i32_1 = arith.constant 0 : i32
    return %c0_i32, %c0_i32_0 : i32, i32
  }
  func.func @transform_4(%arg0: i32) -> (i32, i32) {
    %c0_i32 = arith.constant 0 : i32
    %c0_i32_0 = arith.constant 0 : i32
    %c0_i32_1 = arith.constant 0 : i32
    return %c0_i32, %c0_i32_0 : i32, i32
  }
  func.func @transform_5(%arg0: i32) -> (i32, i32) {
    %c0_i32 = arith.constant 0 : i32
    %c0_i32_0 = arith.constant 0 : i32
    return %arg0, %c0_i32 : i32, i32
  }
}

</mosaic_0001>

<bundles_post_ra>
// kernel: emomlp_forward.1
= control target key start
LH: loop header
LB: loop body
LE: loop exit
PB: predicated region body
PF: predicated region fallthrough
CT: control target
= control target key end

     0   :  { %vm47_vm0 = vcmask 261120   ;;  %s333_s0 = inlined_call_operand.vmem [shape: f32[8,160], index: 0, kind: input, shape index: {}]   ;;  %s334_s1 = inlined_call_operand.vmem [shape: f32[160,128], index: 1, kind: input, shape index: {}]   ;;  %s335_s2 = inlined_call_operand.vmem [shape: f32[1,128], index: 2, kind: input, shape index: {}]   ;;  %s336_s3 = inlined_call_operand.vmem [shape: f32[128,128], index: 3, kind: input, shape index: {}]   ;;  %s337_s4 = inlined_call_operand.vmem [shape: f32[1,128], index: 4, kind: input, shape index: {}]   ;;  %s338_s5 = inlined_call_operand.hbm [shape: f32[8,128], index: 5, kind: output, shape index: {}]  }
   0x1   :  { %v38_v0 = vld [vmem:[%s334_s1 + $0x78] sm:$0xff]  ;;  %v37_v1 = vld [vmem:[%s334_s1 + $0x70] sm:$0xff]  ;;  %v36_v2 = vld [vmem:[%s334_s1 + $0x68] sm:$0xff] }
   0x2   :  { %51 = vmatpush.msra.mxu0 %v38_v0  ;;  %v35_v3 = vld [vmem:[%s334_s1 + $0x60] sm:$0xff]  ;;  %v42_v4 = vld [vmem:[%s334_s1 + $0x98] sm:$0xff]  ;;  %v41_v5 = vld [vmem:[%s334_s1 + $0x90] sm:$0xff] }
   0x3   :  { %83 = vmatpush.msra.mxu1 %v42_v4  ;;  %v34_v6 = vld [vmem:[%s334_s1 + $0x58] sm:$0xff]  ;;  %v40_v7 = vld [vmem:[%s334_s1 + $0x88] sm:$0xff]  ;;  %v106_v9 = vld [vmem:[%s336_s3 + $0x70] sm:$0xff] }
   0x4   :  { %52 = vmatpush.msra.mxu0 %v37_v1  ;;  %v107_v8 = vld [vmem:[%s336_s3 + $0x78] sm:$0xff]  ;;  %v33_v10 = vld [vmem:[%s334_s1 + $0x50] sm:$0xff]  ;;  %v39_v11 = vld [vmem:[%s334_s1 + $0x80] sm:$0xff] }
   0x5   :  { %84 = vmatpush.msra.mxu1 %v41_v5  ;;  %112 = vmatpush.msra.mxu2 %v107_v8  ;;  %v22_v12 = vld [vmem:[%s333_s0 + $0x8] sm:$0xff]  ;;  %v104_v15 = vld [vmem:[%s336_s3 + $0x60] sm:$0xff] }
   0x6   :  { %53 = vmatpush.msra.mxu0 %v36_v2  ;;  %v105_v13 = vld [vmem:[%s336_s3 + $0x68] sm:$0xff]  ;;  %v31_v16 = vld [vmem:[%s334_s1 + $0x40] sm:$0xff] }
   0x7   :  { %85 = vmatpush.msra.mxu1 %v40_v7  ;;  %v32_v14 = vld [vmem:[%s334_s1 + $0x48] sm:$0xff]  ;;  %113 = vmatpush.msra.mxu2 %v106_v9 }
   0x8   :  { %54 = vmatpush.msra.mxu0 %v35_v3 }
   0x9   :  { %86 = vmatpush.msra.mxu1 %v39_v11  ;;  %114 = vmatpush.msra.mxu2 %v105_v13 }
   0xa   :  { %55 = vmatpush.msra.mxu0 %v34_v6  ;;  %149 = vmatmul.msk.f32.vlgmr.msra.gmra.mxu1 %vm47_vm0, %v22_v12 }
   0xc   :  { %56 = vmatpush.msra.mxu0 %v33_v10 }
   0xd   :  { %10 = vsyncpa [#allocation3], 0  ;;  %v103_v17 = vld [vmem:[%s336_s3 + $0x58] sm:$0xff]  ;;  %115 = vmatpush.msra.mxu2 %v104_v15  ;;  %v102_v19 = vld [vmem:[%s336_s3 + $0x50] sm:$0xff]  ;;  %s179_s21 = smov [#allocation2]  }
   0xe   :  { %57 = vmatpush.msra.mxu0 %v32_v14  ;;  %v30_v18 = vld [vmem:[%s334_s1 + $0x38] sm:$0xff]  ;;  %v29_v20 = vld [vmem:[%s334_s1 + $0x30] sm:$0xff]  ;;  %v101_v21 = vld [vmem:[%s336_s3 + $0x48] sm:$0xff]  ;;  %s138_s22 = sshll.u32 %s179_s21, 4  ;;  %s139_s22 = int_to_ptr.vmem [resolvable:$true] %s138_s22 }
   0xf   :  { %116 = vmatpush.msra.mxu2 %v103_v17  ;;  %v28_v22 = vld [vmem:[%s334_s1 + $0x28] sm:$0xff]  ;;  %v100_v23 = vld [vmem:[%s336_s3 + $0x40] sm:$0xff]  ;;  %v99_v25 = vld [vmem:[%s336_s3 + $0x38] sm:$0xff] }
  0x10   :  { %58 = vmatpush.msra.mxu0 %v31_v16  ;;  %v27_v24 = vld [vmem:[%s334_s1 + $0x20] sm:$0xff]  ;;  %v26_v26 = vld [vmem:[%s334_s1 + $0x18] sm:$0xff]  ;;  %v98_v27 = vld [vmem:[%s336_s3 + $0x30] sm:$0xff] }
  0x11   :  { %117 = vmatpush.msra.mxu2 %v102_v19  ;;  %v25_v28 = vld [vmem:[%s334_s1 + $0x10] sm:$0xff]  ;;  %v97_v29 = vld [vmem:[%s336_s3 + $0x28] sm:$0xff]  ;;  %v96_v31 = vld [vmem:[%s336_s3 + $0x20] sm:$0xff] }
  0x12   :  { %59 = vmatpush.msra.mxu0 %v30_v18  ;;  %v24_v30 = vld [vmem:[%s334_s1 + $0x8] sm:$0xff]  ;;  %v23_v32 = vld [vmem:[%s334_s1] sm:$0xff]  ;;  %v95_v34 = vld [vmem:[%s336_s3 + $0x18] sm:$0xff] }
  0x13   :  { %118 = vmatpush.msra.mxu2 %v101_v21  ;;  %v21_v33 = vld [vmem:[%s333_s0] sm:$0xff]  ;;  %v94_v35 = vld [vmem:[%s336_s3 + $0x10] sm:$0xff]  ;;  %v93_v36 = vld [vmem:[%s336_s3 + $0x8] sm:$0xff] }
  0x14   :  { %60 = vmatpush.msra.mxu0 %v29_v20  ;;  %v92_v37 = vld [vmem:[%s336_s3] sm:$0xff]  ;;  %s140_s3 = sshll.u32 %s338_s5, 4  ;;  %s141_s3 = int_to_ptr.hbm [resolvable:$true] %s140_s3 }
  0x15   :  { %119 = vmatpush.msra.mxu2 %v100_v23  ;;  %v151_v38 = vld [vmem:[%s335_s2] ss:$0 sm:$0xff] }
  0x16   :  { %61 = vmatpush.msra.mxu0 %v28_v22  ;;  %v152_v44 = vld [vmem:[%s337_s4] ss:$0 sm:$0xff] }
  0x17   :  { %120 = vmatpush.msra.mxu2 %v99_v25 }
  0x18   :  { %62 = vmatpush.msra.mxu0 %v27_v24 }
  0x19   :  { %121 = vmatpush.msra.mxu2 %v98_v27 }
  0x1a   :  { %63 = vmatpush.msra.mxu0 %v26_v26 }
  0x1b   :  { %122 = vmatpush.msra.mxu2 %v97_v29 }
  0x1c   :  { %64 = vmatpush.msra.mxu0 %v25_v28 }
  0x1d   :  { %123 = vmatpush.msra.mxu2 %v96_v31 }
  0x1e   :  { %65 = vmatpush.msra.mxu0 %v24_v30 }
  0x1f   :  { %124 = vmatpush.msra.mxu2 %v95_v34 }
  0x20   :  { %66 = vmatpush.msra.mxu0 %v23_v32 }
  0x21   :  { %67 = vmatmul.f32.vlgmr.msra.gmra.mxu0 %v21_v33  ;;  %125 = vmatpush.msra.mxu2 %v94_v35 }
  0x23   :  { %126 = vmatpush.msra.mxu2 %v93_v36 }
  0x25   :  { %127 = vmatpush.msra.mxu2 %v92_v37 }
  0x87   :  { %v88_v40 = vpop.f32.mrf.mxu1 }
  0x9e   :  { %v68_v39 = vpop.f32.mrf.mxu0 }
  0x9f   :  { %v69_v41 = vadd.f32 %v151_v38, %v68_v39 }
  0xa1   :  { %v89_v42 = vadd.f32 %v88_v40, %v69_v41 }
  0xa3   :  { %v91_v43 = vmax.f32 %v89_v42, 0.0 }
  0xa5   :  { %128 = vmatmul.f32.vlgmr.msra.gmra.mxu2 %v91_v43 }
 0x128   :  { %v129_v45 = vpop.f32.mrf.mxu2 }
 0x129   :  { %v130_v46 = vadd.f32 %v152_v44, %v129_v45 }
 0x12b   :  { %132 = vst [vmem:[#allocation2] sm:$0xff] %v130_v46 }
 0x12c   :  { %143 = dma.vmem_to_hbm [thread:$0]  %s139_s22, 128, %s141_s3, [#allocation3]  }
 0x12d   :  { %177 = dma.done.wait [#allocation3], 128  }
 0x12e   :  { %178 = vsyncadd [#allocation3], 4294967168 }
 0x12f   :  { %148 = vsyncpa [#allocation3], 1 }

</bundles_post_ra>
